<compile_context>
chip_gen: v7x
topology: tpu7x:2x2x1
jax: 0.10.0
libtpu: 0.0.40
codegen_flags: <defaults>
</compile_context>

<pallas_src>
import jax
import jax.numpy as jnp
from jax.experimental import pallas as pl
from jax.experimental.pallas import tpu as pltpu

# ---------------- small, module-consistent configuration ----------------
B = 2            # batch
R = 8            # number of image regions (visual-stream sequence length)
V_FEAT = 64      # config.v_feature_size
V_HID = 32       # config.v_hidden_size
LOC_RAW = 5      # image_location feature size (fixed by the module: 5 box coords)
LOC_PAD = 8      # padded so the fused contraction width (V_FEAT + 8) is sublane-friendly
LN_EPS = 1e-12


def image_embeddings_kernel(x_ref, w_ref, b_ref, gamma_ref, beta_ref, o_ref):
    """Single invocation: fused projection + residual-free LayerNorm.

    x_ref:     (N, V_FEAT + LOC_PAD)  fused [image_feature | padded image_location]
    w_ref:     (V_FEAT + LOC_PAD, V_HID)  fused [W_img ; padded W_loc]
    b_ref:     (1, V_HID)  b_img + b_loc
    gamma/beta:(1, V_HID)  LayerNorm affine params
    o_ref:     (N, V_HID)
    """
    # --- fused image + location embedding (one MXU matmul instead of two) ---
    y = jnp.dot(x_ref[...], w_ref[...],
                preferred_element_type=jnp.float32) + b_ref[...]

    # --- LayerNorm over the hidden axis (eps = 1e-12) ---
    mean = jnp.mean(y, axis=-1, keepdims=True)
    c = y - mean
    var = jnp.mean(c * c, axis=-1, keepdims=True)
    o_ref[...] = (c * jax.lax.rsqrt(var + LN_EPS)) * gamma_ref[...] + beta_ref[...]
    # Dropout: identity at inference (hidden_dropout_prob only matters in training).


@jax.jit
def bert_image_feature_embeddings(image_feature, image_location,
                                  w_img, b_img, w_loc, b_loc, gamma, beta):
    Bb, Rr, F = image_feature.shape
    N = Bb * Rr
    Hh = w_img.shape[1]

    # ---- wrapper-side fusion plumbing (pure layout, no extra math) ----
    x_img = image_feature.reshape(N, F)                                  # (N, F)
    x_loc = jnp.pad(image_location.reshape(N, LOC_RAW),
                    ((0, 0), (0, LOC_PAD - LOC_RAW)))                    # (N, 8)
    x_fused = jnp.concatenate([x_img, x_loc], axis=1)                    # (N, F+8)
    w_loc_p = jnp.pad(w_loc, ((0, LOC_PAD - LOC_RAW), (0, 0)))           # (8, H)
    w_fused = jnp.concatenate([w_img, w_loc_p], axis=0)                  # (F+8, H)
    b_fused = b_img + b_loc                                              # (1, H)

    vmem = pl.BlockSpec(memory_space=pltpu.MemorySpace.VMEM)
    out = pl.pallas_call(
        image_embeddings_kernel,
        out_shape=jax.ShapeDtypeStruct((N, Hh), jnp.float32),
        in_specs=[vmem, vmem, vmem, vmem, vmem],
        out_specs=vmem,
    )(x_fused, w_fused, b_fused, gamma, beta)
    return out.reshape(Bb, Rr, Hh)


def reference(image_feature, image_location, w_img, b_img, w_loc, b_loc, gamma, beta):
    """Pure-JAX reference mirroring the PyTorch forward (eval mode)."""
    img = image_feature @ w_img + b_img[0]
    loc = image_location @ w_loc + b_loc[0]
    y = img + loc
    mean = jnp.mean(y, axis=-1, keepdims=True)
    var = jnp.mean((y - mean) ** 2, axis=-1, keepdims=True)
    return (y - mean) / jnp.sqrt(var + LN_EPS) * gamma[0] + beta[0]


if __name__ == "__main__":
    key = jax.random.PRNGKey(0)
    keys = jax.random.split(key, 8)

    image_feature = jax.random.normal(keys[0], (B, R, V_FEAT), dtype=jnp.float32)
    image_location = jax.random.uniform(keys[1], (B, R, LOC_RAW), dtype=jnp.float32)

    w_img = jax.random.normal(keys[2], (V_FEAT, V_HID), dtype=jnp.float32) * 0.05
    b_img = jax.random.normal(keys[3], (1, V_HID), dtype=jnp.float32) * 0.01
    w_loc = jax.random.normal(keys[4], (LOC_RAW, V_HID), dtype=jnp.float32) * 0.05
    b_loc = jax.random.normal(keys[5], (1, V_HID), dtype=jnp.float32) * 0.01
    gamma = 1.0 + 0.1 * jax.random.normal(keys[6], (1, V_HID), dtype=jnp.float32)
    beta = 0.01 * jax.random.normal(keys[7], (1, V_HID), dtype=jnp.float32)

    out = bert_image_feature_embeddings(image_feature, image_location,
                                        w_img, b_img, w_loc, b_loc, gamma, beta)
    out = jax.block_until_ready(out)

    ref = reference(image_feature, image_location,
                    w_img, b_img, w_loc, b_loc, gamma, beta)
    assert out.shape == (B, R, V_HID)
    assert jnp.allclose(out, ref, atol=1e-4, rtol=1e-4), "mismatch vs reference"

    print("KERNEL_OK")
</pallas_src>

<mosaic_0001>
module attributes {stable_mosaic.version = 11 : i64} {
  func.func @image_embeddings_kernel(%arg0: memref<16x72xf32, #tpu.memory_space<vmem>>, %arg1: memref<72x32xf32, #tpu.memory_space<vmem>>, %arg2: memref<1x32xf32, #tpu.memory_space<vmem>>, %arg3: memref<1x32xf32, #tpu.memory_space<vmem>>, %arg4: memref<1x32xf32, #tpu.memory_space<vmem>>, %arg5: memref<16x32xf32, #tpu.memory_space<vmem>>) attributes {dimension_semantics = [], scalar_prefetch = 0 : i64, scratch_operands = 0 : i64, tpu.core_type = #tpu.core_type<tc>} {
    %c0 = arith.constant 0 : index
    %c0_0 = arith.constant 0 : index
    %0 = vector.load %arg0[%c0, %c0_0] : memref<16x72xf32, #tpu.memory_space<vmem>>, vector<16x72xf32>
    %c0_1 = arith.constant 0 : index
    %c0_2 = arith.constant 0 : index
    %1 = vector.load %arg1[%c0_1, %c0_2] : memref<72x32xf32, #tpu.memory_space<vmem>>, vector<72x32xf32>
    %cst = arith.constant dense<0.000000e+00> : vector<16x32xf32>
    %2 = tpu.matmul %0, %1, %cst {dimension_numbers = #tpu.dot_dimension_numbers<[1], [0], [0], [1], [0, 0, 1, 1], [], []>} : vector<16x72xf32>, vector<72x32xf32>, vector<16x32xf32> -> vector<16x32xf32>
    %c0_3 = arith.constant 0 : index
    %c0_4 = arith.constant 0 : index
    %3 = vector.load %arg2[%c0_3, %c0_4] : memref<1x32xf32, #tpu.memory_space<vmem>>, vector<1x32xf32>
    %4 = vector.broadcast %3 : vector<1x32xf32> to vector<16x32xf32>
    %5 = arith.addf %2, %4 : vector<16x32xf32>
    %cst_5 = arith.constant dense<0.000000e+00> : vector<16xf32>
    %6 = vector.multi_reduction <add>, %5, %cst_5 [1] : vector<16x32xf32> to vector<16xf32>
    %7 = vector.shape_cast %6 : vector<16xf32> to vector<16x1xf32>
    %cst_6 = arith.constant 3.200000e+01 : f32
    %8 = vector.broadcast %cst_6 : f32 to vector<16x1xf32>
    %9 = arith.divf %7, %8 : vector<16x1xf32>
    %10 = vector.broadcast %9 : vector<16x1xf32> to vector<16x32xf32>
    %11 = arith.subf %5, %10 : vector<16x32xf32>
    %12 = arith.mulf %11, %11 : vector<16x32xf32>
    %cst_7 = arith.constant dense<0.000000e+00> : vector<16xf32>
    %13 = vector.multi_reduction <add>, %12, %cst_7 [1] : vector<16x32xf32> to vector<16xf32>
    %14 = vector.shape_cast %13 : vector<16xf32> to vector<16x1xf32>
    %cst_8 = arith.constant 3.200000e+01 : f32
    %15 = vector.broadcast %cst_8 : f32 to vector<16x1xf32>
    %16 = arith.divf %14, %15 : vector<16x1xf32>
    %cst_9 = arith.constant 9.99999996E-13 : f32
    %17 = vector.broadcast %cst_9 : f32 to vector<16x1xf32>
    %18 = arith.addf %16, %17 : vector<16x1xf32>
    %19 = math.rsqrt %18 : vector<16x1xf32>
    %20 = vector.broadcast %19 : vector<16x1xf32> to vector<16x32xf32>
    %21 = arith.mulf %11, %20 : vector<16x32xf32>
    %c0_10 = arith.constant 0 : index
    %c0_11 = arith.constant 0 : index
    %22 = vector.load %arg3[%c0_10, %c0_11] : memref<1x32xf32, #tpu.memory_space<vmem>>, vector<1x32xf32>
    %23 = vector.broadcast %22 : vector<1x32xf32> to vector<16x32xf32>
    %24 = arith.mulf %21, %23 : vector<16x32xf32>
    %c0_12 = arith.constant 0 : index
    %c0_13 = arith.constant 0 : index
    %25 = vector.load %arg4[%c0_12, %c0_13] : memref<1x32xf32, #tpu.memory_space<vmem>>, vector<1x32xf32>
    %26 = vector.broadcast %25 : vector<1x32xf32> to vector<16x32xf32>
    %27 = arith.addf %24, %26 : vector<16x32xf32>
    %c0_14 = arith.constant 0 : index
    %c0_15 = arith.constant 0 : index
    %28 = vector.load %arg5[%c0_14, %c0_15] : memref<16x32xf32, #tpu.memory_space<vmem>>, vector<16x32xf32>
    tpu.vector_store %arg5[%c0_14, %c0_15], %27 {strides = array<i32>} : memref<16x32xf32, #tpu.memory_space<vmem>>, vector<16x32xf32>,
    return
  }
}

</mosaic_0001>

<bundles_post_ra>
// kernel: bert_image_feature_embeddings.1
= control target key start
LH: loop header
LB: loop body
LE: loop exit
PB: predicated region body
PF: predicated region fallthrough
CT: control target
= control target key end

     0   :  { %vm39_vm0 = vcmask 588800   ;;  %s364_s0 = inlined_call_operand.vmem [shape: f32[16,72], index: 0, kind: input, shape index: {}]   ;;  %s365_s1 = inlined_call_operand.vmem [shape: f32[72,32], index: 1, kind: input, shape index: {}]   ;;  %s366_s2 = inlined_call_operand.vmem [shape: f32[1,32], index: 2, kind: input, shape index: {}]   ;;  %s367_s3 = inlined_call_operand.vmem [shape: f32[1,32], index: 3, kind: input, shape index: {}]   ;;  %s368_s4 = inlined_call_operand.vmem [shape: f32[1,32], index: 4, kind: input, shape index: {}]   ;;  %s369_s5 = inlined_call_operand.hbm [shape: f32[16,32], index: 5, kind: output, shape index: {}]  }
   0x1   :  { %v23_v0 = vld [vmem:[%s365_s1] sm:$0xff]  ;;  %v24_v1 = vld [vmem:[%s365_s1 + $0x8] sm:$0xff]  ;;  %v25_v2 = vld [vmem:[%s365_s1 + $0x10] sm:$0xff] }
   0x2   :  { %v222_v3 = vpack.c.bf16 %v24_v1, %v23_v0  ;;  %v26_v4 = vld [vmem:[%s365_s1 + $0x18] sm:$0xff]  ;;  %v27_v6 = vld [vmem:[%s365_s1 + $0x20] sm:$0xff]  ;;  %v28_v7 = vld [vmem:[%s365_s1 + $0x28] sm:$0xff] }
   0x3   :  { %v226_v5 = vpack.c.bf16 %v26_v4, %v25_v2  ;;  %v21_v8 = vld [vmem:[%s364_s0] sm:$0xff] }
   0x4   :  { %223 = vmatprep.subr.bf16.mxu0 %v222_v3 }
   0x5   :  { %10 = vsyncpa [#allocation3], 0  ;;  %225 = vmatpush3.bf16.msra.mxu0 %v222_v3  ;;  %219 = vmatprep.mubr.msk.f32.mxu0 %vm39_vm0, %v21_v8  ;;  %v230_v9 = vpack.c.bf16 %v28_v7, %v27_v6  ;;  %v29_v10 = vld [vmem:[%s365_s1 + $0x30] sm:$0xff]  ;;  %v30_v11 = vld [vmem:[%s365_s1 + $0x38] sm:$0xff]  ;;  %vm121_vm1 = vcmask 261120   ;;  %s269_s18 = smov [#allocation2]  }
   0x6   :  { %227 = vmatprep.subr.bf16.mxu0 %v226_v5  ;;  %v234_v12 = vpack.c.bf16 %v30_v11, %v29_v10  ;;  %v31_v13 = vld [vmem:[%s365_s1 + $0x40] sm:$0xff]  ;;  %v22_v14 = vld [vmem:[%s364_s0 + $0x8] sm:$0xff]  ;;  %s174_s19 = sshll.u32 %s269_s18, 4  ;;  %s175_s19 = int_to_ptr.vmem [resolvable:$true] %s174_s19 }
   0x7   :  { %v185_v15 = vld [vmem:[%s366_s2] ss:$0 sm:$0xff]  ;;  %s245_s20 = scalar_lea.vmem %s175_s19, 256  ;;  %p250_p1 = scmp.lt.s32.totalorder %s175_s19, %s175_s19 }
   0x8   :  { %v188_v39 = vld [vmem:[%s367_s3] ss:$0 sm:$0xff]  ;;  %p246_p0 = scmp.ne.s32.totalorder %s175_s19, %s245_s20  ;;  %p251_p2 = scmp.lt.s32.totalorder %s245_s20, %s245_s20 }
   0x9   :  { %229 = vmatpush3.bf16.msra.mxu0 %v226_v5  ;;  %v189_v41 = vld [vmem:[%s368_s4] ss:$0 sm:$0xff] }
   0xa   :  { %231 = vmatprep.subr.bf16.mxu0 %v230_v9  ;;  %p252_p3 = por %p251_p2, %p250_p1 }
   0xc   :  { %p253_p4 = pnand %p252_p3, %p246_p0 }
   0xd   :  { %233 = vmatpush3.bf16.msra.mxu0 %v230_v9 }
   0xe   :  { %235 = vmatprep.subr.bf16.mxu0 %v234_v12 }
  0x11   :  { %237 = vmatpush3.bf16.msra.mxu0 %v234_v12 }
  0x12   :  { %217 = vmatprep.subr.mxu0 %v31_v13 }
  0x15   :  { %218 = vmatpush3.msra.mxu0 %v31_v13 }
  0x16   :  { %220 = vmatmul.mubr.msk.f32.vlgmr.msra.gmra.mrb[0].mxu0 %vm39_vm0, %v22_v14 }
  0xe9   :  { %v221_v16 = vpop.f32.mrb[0].mxu0 }
  0xea   :  { %v112_v17 = vpop.f32.mrb[1].mxu0  ;;  %v118_v19 = vadd.f32 %v221_v16, %v185_v15 }
  0xeb   :  { %v113_v18 = vadd.f32 %v185_v15, %v112_v17 }
  0xec   :  { %v125_v21 = vsel %vm121_vm1, %v118_v19, 0.0 }
  0xed   :  { %v122_v20 = vsel %vm121_vm1, %v113_v18, 0.0 }
  0xee   :  { %123 = vadd.xlane.f32.xlu0 %v122_v20 }
  0xf2   :  { %126 = vadd.xlane.f32.xlu0 %v125_v21 }
 0x17b   :  { %v124_v22 = vpop.xlane.xlu0 %123 }
 0x17c   :  { %v129_v23 = vmul.f32 0.03125, %v124_v22 }
 0x17e   :  { %v131_v24 = vsub.f32 %v113_v18, %v129_v23 }
 0x17f   :  { %v127_v25 = vpop.xlane.xlu0 %126 }
 0x180   :  { %v130_v26 = vmul.f32 0.03125, %v127_v25  ;;  %v133_v27 = vmul.f32 %v131_v24, %v131_v24 }
 0x182   :  { %v132_v28 = vsub.f32 %v118_v19, %v130_v26  ;;  %v135_v29 = vsel %vm121_vm1, %v133_v27, 0.0 }
 0x183   :  { %136 = vadd.xlane.f32.xlu1 %v135_v29 }
 0x184   :  { %v134_v30 = vmul.f32 %v132_v28, %v132_v28 }
 0x186   :  { %v138_v31 = vsel %vm121_vm1, %v134_v30, 0.0 }
 0x187   :  { %139 = vadd.xlane.f32.xlu1 %v138_v31 }
 0x210   :  { %v137_v32 = vpop.xlane.xlu1 %136 }
 0x211   :  { %v141_v33 = vmul.f32 0.03125, %v137_v32 }
 0x213   :  { %v143_v34 = vadd.f32 1e-12, %v141_v33 }
 0x214   :  { %v140_v35 = vpop.xlane.xlu1 %139 }
 0x215   :  { %241 = vrsqrt.f32 %v143_v34  ;;  %v142_v36 = vmul.f32 0.03125, %v140_v35 }
 0x217   :  { %v144_v37 = vadd.f32 1e-12, %v142_v36 }
 0x219   :  { %243 = vrsqrt.f32 %v144_v37 }
 0x21f   :  { %v242_v38 = vpop.eup %241 }
 0x220   :  { %v147_v40 = vmul.f32 %v242_v38, %v131_v24 }
 0x222   :  { %v156_v42 = vmul.f32 %v188_v39, %v147_v40 }
 0x223   :  { %v244_v43 = vpop.eup %243 }
 0x224   :  { %v148_v44 = vmul.f32 %v244_v43, %v132_v28  ;;  %v165_v45 = vadd.f32 %v189_v41, %v156_v42 }
 0x226   :  { %v157_v46 = vmul.f32 %v188_v39, %v148_v44  ;;  %167 = vst.msk [vmem:[#allocation2] sm:$0xff] %vm121_vm1, %v165_v45 }
 0x228   :  { %v166_v47 = vadd.f32 %v189_v41, %v157_v46 }
 0x22a   :  { %168 = vst.msk [vmem:[#allocation2 + $0x8] sm:$0xff] %vm121_vm1, %v166_v47 }
 0x22b   :  { %256 = shalt.err (!%p253_p4)
}
 0x22c   :  { %s257_s21 = scalar_lea.hbm %s369_s5, 256 }
 0x22d   :  { %p258_p5 = scmp.ne.s32.totalorder %s369_s5, %s257_s21  ;;  %p261_p6 = scmp.lt.u32.totalorder %s257_s21, %s369_s5 }
 0x22f   :  { %p263_p7 = pnand %p261_p6, %p258_p5 }
 0x231   :  { %266 = shalt.err (!%p263_p7)
}
 0x232   :  { %s270_s26 = smov 128   ;;  %s271_s27 = smov 8  }
 0x233   :  { %180 = dma.vmem_to_hbm [thread:$0]  %s175_s19, 256, %s369_s5, [#allocation3], %s270_s26, %s270_s26, %s271_s27  }
 0x234   :  { %267 = dma.done.wait [#allocation3], 256  }
 0x235   :  { %268 = vsyncadd [#allocation3], 4294967040 }
 0x236   :  { %184 = vsyncpa [#allocation3], 1 }

</bundles_post_ra>
